<compile_context>
chip_gen: v6e
topology: v6e:2x2x1
jax: 0.10.0
libtpu: 0.0.40
codegen_flags: <defaults>
</compile_context>

<pallas_src>
import functools

import jax
import jax.numpy as jnp
from jax.experimental import pallas as pl
from jax.experimental.pallas import tpu as pltpu

LANE = 128                              # pixels per lane-row
TR_MAX = 256                            # max sublane-rows per grid step (32K px)
VMEM_BLOCK_BUDGET = 24 * 1024 * 1024    # double-buffered blocks + scratch (v7x-safe)
VMEM_LIMIT = 48 * 1024 * 1024           # < 64 MiB physical VMEM of v7x


def _round_up(x, m):
    return ((x + m - 1) // m) * m


def _pick_tile_rows(rows_img, num_classes, pred_itemsize):
    """Rows (of 128 pixels) per grid step: as large as the VMEM budget allows."""
    sub = 8 if pred_itemsize >= 4 else (16 if pred_itemsize == 2 else 32)

    def vmem_bytes(tr):
        pred_blk = 2 * tr * LANE * num_classes * pred_itemsize  # double-buffered
        gt_blk = 2 * tr * LANE * 4
        loss_blk = 2 * tr * LANE * 4
        scratch = 2 * tr * LANE * 4
        return pred_blk + gt_blk + loss_blk + scratch

    tr = TR_MAX
    while tr > sub and vmem_bytes(tr) > VMEM_BLOCK_BUDGET:
        tr //= 2
    tr = max(sub, (tr // sub) * sub)
    tr = min(tr, _round_up(rows_img, sub))
    return tr


def _ce_ohem_kernel(pred_ref, gt_ref, loss_ref, psum_loss_ref, psum_valid_ref,
                    acc_loss, acc_valid, *, ignore_index):
    t = pl.program_id(1)

    @pl.when(t == 0)
    def _init():
        acc_loss[...] = jnp.zeros_like(acc_loss)
        acc_valid[...] = jnp.zeros_like(acc_valid)

    x = pred_ref[...].astype(jnp.float32)             # (C, TR, 128) logits
    g = gt_ref[...]                                   # (TR, 128) int32 labels
    valid = (g != ignore_index).astype(jnp.float32)   # (TR, 128)

    # numerically stable CE: lse(x) - x[label]; class axis (0) is non-minor,
    # so max/sum over classes are plain VPU ops across vregs (no XLU).
    m = jnp.max(x, axis=0)                            # (TR, 128)
    e = jnp.exp(x - m[None])                          # (C, TR, 128)  (EUP)
    lse = m + jnp.log(jnp.sum(e, axis=0))             # (TR, 128)
    cls = jax.lax.broadcasted_iota(jnp.int32, x.shape, 0)
    picked = jnp.sum(jnp.where(cls == g[None], x, 0.0), axis=0)

    loss = (lse - picked) * valid                     # ignored / padded -> 0
    loss_ref[...] = loss                              # lane-dense store

    acc_loss[...] += loss                             # pure VPU running sums
    acc_valid[...] += valid

    # single cross-sublane reduce per image, at the end of its pixel range
    @pl.when(t == pl.num_programs(1) - 1)
    def _finalize():
        psum_loss_ref[...] = jnp.sum(acc_loss[...], axis=0, keepdims=True)
        psum_valid_ref[...] = jnp.sum(acc_valid[...], axis=0, keepdims=True)


@functools.partial(jax.jit,
                   static_argnames=("top_ratio", "top_weight", "ignore_index"))
def ce_ohem(pred, gt, top_ratio=0.3, top_weight=1.0, ignore_index=-1):
    """Forward pass of CE_OHEM.  Returns a scalar float32 loss."""
    N, C, H, W = pred.shape
    HW = H * W
    P = N * HW

    # ---- tile sizing --------------------------------------------------------
    rows_img = -(-HW // LANE)                       # 128-pixel rows per image
    TR = _pick_tile_rows(rows_img, C, jnp.dtype(pred.dtype).itemsize)
    ROWS = _round_up(rows_img, TR)
    steps = ROWS // TR
    HW_pad = ROWS * LANE

    # ---- pixels-on-lanes with NO transposes (last-axis pad only) ------------
    pred_t = jnp.pad(pred.reshape(N, C, HW),
                     ((0, 0), (0, 0), (0, HW_pad - HW))
                     ).reshape(N, C, ROWS, LANE)
    gt_t = jnp.pad(gt.reshape(N, HW).astype(jnp.int32),
                   ((0, 0), (0, HW_pad - HW)),
                   constant_values=ignore_index).reshape(N, ROWS, LANE)

    kernel = functools.partial(_ce_ohem_kernel, ignore_index=ignore_index)
    loss_t, psum_loss, psum_valid = pl.pallas_call(
        kernel,
        out_shape=(
            jax.ShapeDtypeStruct((N, ROWS, LANE), jnp.float32),   # per-pixel loss
            jax.ShapeDtypeStruct((N, 1, LANE), jnp.float32),      # per-image sum(loss)
            jax.ShapeDtypeStruct((N, 1, LANE), jnp.float32),      # per-image sum(valid)
        ),
        grid_spec=pltpu.PrefetchScalarGridSpec(
            num_scalar_prefetch=0,
            grid=(N, steps),
            in_specs=[
                pl.BlockSpec((None, C, TR, LANE), lambda n, t: (n, 0, t, 0)),
                pl.BlockSpec((None, TR, LANE), lambda n, t: (n, t, 0)),
            ],
            out_specs=[
                pl.BlockSpec((None, TR, LANE), lambda n, t: (n, t, 0)),
                pl.BlockSpec((None, 1, LANE), lambda n, t: (n, 0, 0)),
                pl.BlockSpec((None, 1, LANE), lambda n, t: (n, 0, 0)),
            ],
            scratch_shapes=[
                pltpu.VMEM((TR, LANE), jnp.float32),   # running sum of losses
                pltpu.VMEM((TR, LANE), jnp.float32),   # running count of valid
            ],
        ),
        compiler_params=pltpu.CompilerParams(
            dimension_semantics=("parallel", "arbitrary"),
            vmem_limit_bytes=VMEM_LIMIT,
        ),
    )(pred_t, gt_t)

    # ---- epilogue (fully on-device, jittable) --------------------------------
    sum_loss = jnp.sum(psum_loss)
    valid_num = jnp.sum(psum_valid)
    loss_total = sum_loss / (valid_num + 1e-12)

    if int(P * top_ratio) <= 0:        # static bound: topk_num is always 0
        return loss_total

    # TODO(synk): exact torch.topk has no clean Pallas primitive; the top-k sum
    # is recovered exactly (up to float-precision ties) via a 32-step threshold
    # bisection + one masked-relu sum — no device-wide sort, no host readback.
    # Extra padded zeros in the pool are interchangeable with masked zeros and
    # do not change the top-k values (loss >= 0 everywhere).
    loss_pool = loss_t.reshape(-1)
    topk_num = jnp.floor(valid_num * top_ratio).astype(jnp.int32)
    hi0 = jnp.max(loss_pool) + jnp.float32(1.0)

    def body(_, carry):
        lo, hi = carry
        mid = 0.5 * (lo + hi)
        take = jnp.sum(loss_pool >= mid) >= topk_num
        return jnp.where(take, mid, lo), jnp.where(take, hi, mid)

    thr, _ = jax.lax.fori_loop(0, 32, body, (jnp.float32(0.0), hi0))
    k_f = topk_num.astype(jnp.float32)
    topk_sum = jnp.sum(jnp.maximum(loss_pool - thr, 0.0)) + k_f * thr
    topk_mean = topk_sum / jnp.maximum(k_f, 1.0)
    ohem = jnp.where(topk_num > 0, jnp.float32(top_weight) * topk_mean,
                     jnp.float32(0.0))
    return loss_total + ohem


def _ce_ohem_reference(pred, gt, top_ratio, top_weight, ignore_index):
    """Pure-JAX reference of the PyTorch module (eager, exact top-k)."""
    N, C, H, W = pred.shape
    logits = jnp.transpose(pred, (0, 2, 3, 1)).reshape(-1, C).astype(jnp.float32)
    labels = gt.reshape(-1).astype(jnp.int32)
    valid = (labels != ignore_index)
    m = jnp.max(logits, axis=-1)
    lse = m + jnp.log(jnp.sum(jnp.exp(logits - m[:, None]), axis=-1))
    picked = jnp.take_along_axis(
        logits, jnp.clip(labels, 0, C - 1)[:, None], axis=-1)[:, 0]
    loss = jnp.where(valid, lse - picked, 0.0)
    valid_num = jnp.sum(valid.astype(jnp.float32))
    loss_total = jnp.sum(loss) / (valid_num + 1e-12)
    topk_num = int(jnp.floor(valid_num * jnp.float32(top_ratio)))
    if topk_num == 0:
        return loss_total
    topk = jax.lax.top_k(loss, topk_num)[0]
    return loss_total + jnp.float32(top_weight) * jnp.mean(topk)


if __name__ == "__main__":
    key = jax.random.PRNGKey(0)
    k1, k2 = jax.random.split(key)
    # segmentation-style shapes: pred (N, C, H, W), gt (N, H, W); -1 = ignore
    pred = jax.random.normal(k1, (2, 4, 16, 16), dtype=jnp.float32)
    gt = jax.random.randint(k2, (2, 16, 16), -1, 4)

    loss = ce_ohem(pred, gt, top_ratio=0.3, top_weight=1.0, ignore_index=-1)
    loss = jax.block_until_ready(loss)

    ref = _ce_ohem_reference(pred, gt, 0.3, 1.0, -1)
    assert jnp.allclose(loss, ref, rtol=1e-3, atol=1e-5), (float(loss), float(ref))

    print("KERNEL_OK")
</pallas_src>

<mosaic_0001>
module attributes {stable_mosaic.version = 11 : i64} {
  func.func @_ce_ohem_kernel(%arg0: i32, %arg1: i32, %arg2: memref<1x4x8x128xf32, #tpu.memory_space<vmem>>, %arg3: memref<1x8x128xi32, #tpu.memory_space<vmem>>, %arg4: memref<1x8x128xf32, #tpu.memory_space<vmem>>, %arg5: memref<1x1x128xf32, #tpu.memory_space<vmem>>, %arg6: memref<1x1x128xf32, #tpu.memory_space<vmem>>, %arg7: memref<8x128xf32, #tpu.memory_space<vmem>>, %arg8: memref<8x128xf32, #tpu.memory_space<vmem>>) attributes {dimension_semantics = [#tpu.dimension_semantics<parallel>, #tpu.dimension_semantics<arbitrary>], iteration_bounds = array<i64: 2, 1>, scalar_prefetch = 0 : i64, scratch_operands = 2 : i64, tpu.core_type = #tpu.core_type<tc>, window_params = [{transform_indices = @transform_0, window_bounds = array<i64: 1, 4, 8, 128>}, {transform_indices = @transform_1, window_bounds = array<i64: 1, 8, 128>}, {transform_indices = @transform_2, window_bounds = array<i64: 1, 8, 128>}, {transform_indices = @transform_3, window_bounds = array<i64: 1, 1, 128>}, {transform_indices = @transform_4, window_bounds = array<i64: 1, 1, 128>}]} {
    %c0_i32 = arith.constant 0 : i32
    %0 = arith.cmpi eq, %arg1, %c0_i32 : i32
    %1 = arith.extui %0 : i1 to i32
    %c0_i32_0 = arith.constant 0 : i32
    %2 = arith.cmpi ne, %1, %c0_i32_0 : i32
    scf.if %2 {
      %cst_23 = arith.constant 0.000000e+00 : f32
      %40 = vector.broadcast %cst_23 : f32 to vector<8x128xf32>
      %c0_24 = arith.constant 0 : index
      %c0_25 = arith.constant 0 : index
      %41 = vector.load %arg7[%c0_24, %c0_25] : memref<8x128xf32, #tpu.memory_space<vmem>>, vector<8x128xf32>
      tpu.vector_store %arg7[%c0_24, %c0_25], %40 {strides = array<i32>} : memref<8x128xf32, #tpu.memory_space<vmem>>, vector<8x128xf32>,
      %cst_26 = arith.constant 0.000000e+00 : f32
      %42 = vector.broadcast %cst_26 : f32 to vector<8x128xf32>
      %c0_27 = arith.constant 0 : index
      %c0_28 = arith.constant 0 : index
      %43 = vector.load %arg8[%c0_27, %c0_28] : memref<8x128xf32, #tpu.memory_space<vmem>>, vector<8x128xf32>
      tpu.vector_store %arg8[%c0_27, %c0_28], %42 {strides = array<i32>} : memref<8x128xf32, #tpu.memory_space<vmem>>, vector<8x128xf32>,
    } else {
    }
    %c0 = arith.constant 0 : index
    %c0_1 = arith.constant 0 : index
    %c0_2 = arith.constant 0 : index
    %c0_3 = arith.constant 0 : index
    %3 = vector.load %arg2[%c0, %c0_1, %c0_2, %c0_3] : memref<1x4x8x128xf32, #tpu.memory_space<vmem>>, vector<1x4x8x128xf32>
    %4 = vector.shape_cast %3 : vector<1x4x8x128xf32> to vector<4x8x128xf32>
    %c0_4 = arith.constant 0 : index
    %c0_5 = arith.constant 0 : index
    %c0_6 = arith.constant 0 : index
    %5 = vector.load %arg3[%c0_4, %c0_5, %c0_6] : memref<1x8x128xi32, #tpu.memory_space<vmem>>, vector<1x8x128xi32>
    %6 = vector.shape_cast %5 : vector<1x8x128xi32> to vector<8x128xi32>
    %c-1_i32 = arith.constant -1 : i32
    %7 = vector.broadcast %c-1_i32 : i32 to vector<8x128xi32>
    %8 = arith.cmpi ne, %6, %7 : vector<8x128xi32>
    %9 = arith.extui %8 : vector<8x128xi1> to vector<8x128xi32>
    %10 = arith.sitofp %9 : vector<8x128xi32> to vector<8x128xf32>
    %cst = arith.constant dense<0xFF800000> : vector<8x128xf32>
    %11 = vector.multi_reduction <maximumf>, %4, %cst [0] : vector<4x8x128xf32> to vector<8x128xf32>
    %12 = vector.shape_cast %11 : vector<8x128xf32> to vector<1x8x128xf32>
    %13 = vector.broadcast %12 : vector<1x8x128xf32> to vector<4x8x128xf32>
    %14 = arith.subf %4, %13 : vector<4x8x128xf32>
    %15 = math.exp %14 : vector<4x8x128xf32>
    %cst_7 = arith.constant dense<0.000000e+00> : vector<8x128xf32>
    %16 = vector.multi_reduction <add>, %15, %cst_7 [0] : vector<4x8x128xf32> to vector<8x128xf32>
    %17 = math.log %16 : vector<8x128xf32>
    %18 = arith.addf %11, %17 : vector<8x128xf32>
    %19 = tpu.iota {dimensions = array<i32: 0>} : vector<4x8x128xi32>
    %20 = vector.shape_cast %6 : vector<8x128xi32> to vector<1x8x128xi32>
    %21 = vector.broadcast %20 : vector<1x8x128xi32> to vector<4x8x128xi32>
    %22 = arith.cmpi eq, %19, %21 : vector<4x8x128xi32>
    %cst_8 = arith.constant 0.000000e+00 : f32
    %23 = vector.broadcast %cst_8 : f32 to vector<4x8x128xf32>
    %24 = arith.select %22, %4, %23 : vector<4x8x128xi1>, vector<4x8x128xf32>
    %cst_9 = arith.constant dense<0.000000e+00> : vector<8x128xf32>
    %25 = vector.multi_reduction <add>, %24, %cst_9 [0] : vector<4x8x128xf32> to vector<8x128xf32>
    %26 = arith.subf %18, %25 : vector<8x128xf32>
    %27 = arith.mulf %26, %10 : vector<8x128xf32>
    %c0_10 = arith.constant 0 : index
    %c0_11 = arith.constant 0 : index
    %c0_12 = arith.constant 0 : index
    %28 = vector.load %arg4[%c0_10, %c0_11, %c0_12] : memref<1x8x128xf32, #tpu.memory_space<vmem>>, vector<1x8x128xf32>
    %29 = vector.shape_cast %28 : vector<1x8x128xf32> to vector<8x128xf32>
    %30 = vector.shape_cast %27 : vector<8x128xf32> to vector<1x8x128xf32>
    tpu.vector_store %arg4[%c0_10, %c0_11, %c0_12], %30 {strides = array<i32>} : memref<1x8x128xf32, #tpu.memory_space<vmem>>, vector<1x8x128xf32>,
    %c0_13 = arith.constant 0 : index
    %c0_14 = arith.constant 0 : index
    %31 = vector.load %arg7[%c0_13, %c0_14] : memref<8x128xf32, #tpu.memory_space<vmem>>, vector<8x128xf32>
    %32 = arith.addf %31, %27 : vector<8x128xf32>
    %c0_15 = arith.constant 0 : index
    %c0_16 = arith.constant 0 : index
    %33 = vector.load %arg7[%c0_15, %c0_16] : memref<8x128xf32, #tpu.memory_space<vmem>>, vector<8x128xf32>
    tpu.vector_store %arg7[%c0_15, %c0_16], %32 {strides = array<i32>} : memref<8x128xf32, #tpu.memory_space<vmem>>, vector<8x128xf32>,
    %c0_17 = arith.constant 0 : index
    %c0_18 = arith.constant 0 : index
    %34 = vector.load %arg8[%c0_17, %c0_18] : memref<8x128xf32, #tpu.memory_space<vmem>>, vector<8x128xf32>
    %35 = arith.addf %34, %10 : vector<8x128xf32>
    %c0_19 = arith.constant 0 : index
    %c0_20 = arith.constant 0 : index
    %36 = vector.load %arg8[%c0_19, %c0_20] : memref<8x128xf32, #tpu.memory_space<vmem>>, vector<8x128xf32>
    tpu.vector_store %arg8[%c0_19, %c0_20], %35 {strides = array<i32>} : memref<8x128xf32, #tpu.memory_space<vmem>>, vector<8x128xf32>,
    %c0_i32_21 = arith.constant 0 : i32
    %37 = arith.cmpi eq, %arg1, %c0_i32_21 : i32
    %38 = arith.extui %37 : i1 to i32
    %c0_i32_22 = arith.constant 0 : i32
    %39 = arith.cmpi ne, %38, %c0_i32_22 : i32
    scf.if %39 {
      %c0_23 = arith.constant 0 : index
      %c0_24 = arith.constant 0 : index
      %40 = vector.load %arg7[%c0_23, %c0_24] : memref<8x128xf32, #tpu.memory_space<vmem>>, vector<8x128xf32>
      %cst_25 = arith.constant dense<0.000000e+00> : vector<128xf32>
      %41 = vector.multi_reduction <add>, %40, %cst_25 [0] : vector<8x128xf32> to vector<128xf32>
      %42 = vector.shape_cast %41 : vector<128xf32> to vector<1x128xf32>
      %c0_26 = arith.constant 0 : index
      %c0_27 = arith.constant 0 : index
      %c0_28 = arith.constant 0 : index
      %43 = vector.load %arg5[%c0_26, %c0_27, %c0_28] : memref<1x1x128xf32, #tpu.memory_space<vmem>>, vector<1x1x128xf32>
      %44 = vector.shape_cast %43 : vector<1x1x128xf32> to vector<1x128xf32>
      %45 = vector.shape_cast %42 : vector<1x128xf32> to vector<1x1x128xf32>
      tpu.vector_store %arg5[%c0_26, %c0_27, %c0_28], %45 {strides = array<i32>} : memref<1x1x128xf32, #tpu.memory_space<vmem>>, vector<1x1x128xf32>,
      %c0_29 = arith.constant 0 : index
      %c0_30 = arith.constant 0 : index
      %46 = vector.load %arg8[%c0_29, %c0_30] : memref<8x128xf32, #tpu.memory_space<vmem>>, vector<8x128xf32>
      %cst_31 = arith.constant dense<0.000000e+00> : vector<128xf32>
      %47 = vector.multi_reduction <add>, %46, %cst_31 [0] : vector<8x128xf32> to vector<128xf32>
      %48 = vector.shape_cast %47 : vector<128xf32> to vector<1x128xf32>
      %c0_32 = arith.constant 0 : index
      %c0_33 = arith.constant 0 : index
      %c0_34 = arith.constant 0 : index
      %49 = vector.load %arg6[%c0_32, %c0_33, %c0_34] : memref<1x1x128xf32, #tpu.memory_space<vmem>>, vector<1x1x128xf32>
      %50 = vector.shape_cast %49 : vector<1x1x128xf32> to vector<1x128xf32>
      %51 = vector.shape_cast %48 : vector<1x128xf32> to vector<1x1x128xf32>
      tpu.vector_store %arg6[%c0_32, %c0_33, %c0_34], %51 {strides = array<i32>} : memref<1x1x128xf32, #tpu.memory_space<vmem>>, vector<1x1x128xf32>,
    } else {
    }
    return
  }
  func.func @transform_0(%arg0: i32, %arg1: i32) -> (i32, i32, i32, i32) {
    %c0_i32 = arith.constant 0 : i32
    %c0_i32_0 = arith.constant 0 : i32
    %c0_i32_1 = arith.constant 0 : i32
    return %arg0, %c0_i32, %arg1, %c0_i32_0 : i32, i32, i32, i32
  }
  func.func @transform_1(%arg0: i32, %arg1: i32) -> (i32, i32, i32) {
    %c0_i32 = arith.constant 0 : i32
    %c0_i32_0 = arith.constant 0 : i32
    return %arg0, %arg1, %c0_i32 : i32, i32, i32
  }
  func.func @transform_2(%arg0: i32, %arg1: i32) -> (i32, i32, i32) {
    %c0_i32 = arith.constant 0 : i32
    %c0_i32_0 = arith.constant 0 : i32
    return %arg0, %arg1, %c0_i32 : i32, i32, i32
  }
  func.func @transform_3(%arg0: i32, %arg1: i32) -> (i32, i32, i32) {
    %c0_i32 = arith.constant 0 : i32
    %c0_i32_0 = arith.constant 0 : i32
    %c0_i32_1 = arith.constant 0 : i32
    return %arg0, %c0_i32, %c0_i32_0 : i32, i32, i32
  }
  func.func @transform_4(%arg0: i32, %arg1: i32) -> (i32, i32, i32) {
    %c0_i32 = arith.constant 0 : i32
    %c0_i32_0 = arith.constant 0 : i32
    %c0_i32_1 = arith.constant 0 : i32
    return %arg0, %c0_i32, %c0_i32_0 : i32, i32, i32
  }
}

</mosaic_0001>

<bundles_post_ra>
// kernel: ce_ohem.1
= control target key start
LH: loop header
LB: loop body
LE: loop exit
PB: predicated region body
PF: predicated region fallthrough
CT: control target
= control target key end

     0   :  { %s586_s15 = smov 0   ;;  %s588_s16 = smov 0   ;;  %s638_s0 = inlined_call_operand.vmem [shape: f32[2,4,8,128], index: 0, kind: input, shape index: {}]   ;;  %s639_s1 = inlined_call_operand.vmem [shape: s32[2,8,128], index: 1, kind: input, shape index: {}]   ;;  %s640_s2 = inlined_call_operand.vmem [shape: f32[2,8,128], index: 2, kind: output, shape index: {0}]   ;;  %s641_s3 = inlined_call_operand.vmem [shape: f32[2,1,128], index: 3, kind: output, shape index: {1}]   ;;  %s642_s4 = inlined_call_operand.vmem [shape: f32[2,1,128], index: 4, kind: output, shape index: {2}]  }
   0x1   :  { %s590_s17 = smov 0  }
   0x2 LB: > { %s27_s18 = sadd.s32 1, %s554_s16  ;;  %p492_p0 = scmp.ge.s32.totalorder %s558_s17, 1  ;;  %s558_s17 = sphi %s590_s17, %s15_s17   ;;  %s554_s16 = sphi %s588_s16, %s644_s16   ;;  %s550_s15 = sphi %s586_s15, %s643_s15  }
   0x3   : > { %p29_p1 = scmp.ge.s32.totalorder %s27_s18, 2  ;;  %p200_p2 = scmp.lt.s32.totalorder %s558_s17, 3 }
   0x5   : > { %s646_s18 = smov (%p29_p1, %s27_s18), 0  ;;  %p201_p3 = pnand %p492_p0, %p200_p2 }
   0x6   : > { %p244_p4 = scmp.lt.s32.totalorder (!%p201_p3), %s550_s15, 1 }
   0x7   : > { %204 = sbr.rel (%p201_p3) target bundleno = 81 (0x51), region = 28 }
   0xc   : > { %s648_s15 = smov (!%p244_p4, %s550_s15), 1  ;;  %v560_v7 = vmov 0.0  }
   0xd   : > { %s500_s19 = sshll.u32 %s648_s15, 5  ;;  %s495_s20 = sshll.u32 %s648_s15, 3 }
   0xe   : > { %s251_s23 = scalar_lea.vmem %s638_s0, %s500_s19  ;;  %s258_s26 = scalar_lea.vmem %s639_s1, %s495_s20 }
   0xf   : > { %v278_v0 = vld [vmem:[%s251_s23] sm:$0xff]  ;;  %v279_v1 = vld [vmem:[%s251_s23 + $0x8] sm:$0xff]  ;;  %v280_v2 = vld [vmem:[%s251_s23 + $0x10] sm:$0xff]  ;;  %s271_s29 = scalar_lea.vmem %s642_s4, %s648_s15  ;;  %s265_s6 = scalar_lea.vmem %s640_s2, %s495_s20 }
  0x10   : > { %v281_v3 = vld [vmem:[%s251_s23 + $0x18] sm:$0xff]  ;;  %v282_v4 = vld [vmem:[%s258_s26] sm:$0xff]  ;;  %v286_v5 = vmax.f32 %v278_v0, %v279_v1  ;;  %s268_s9 = scalar_lea.vmem %s641_s3, %s648_s15 }
  0x11   : > { %vm283_vm0 = vcmp.ne.s32.totalorder %v282_v4, 4294967295  ;;  %v287_v6 = vmax.f32 %v280_v2, %v281_v3  ;;  %vm307_vm1 = vcmp.eq.s32.totalorder %v282_v4, 0  ;;  %vm308_vm2 = vcmp.eq.s32.totalorder %v282_v4, 1 }
  0x12   : > { %v497_v8 = vsel %vm283_vm0, 1.0, %v560_v7  ;;  %v311_v31 = vsel %vm307_vm1, %v278_v0, 0.0  ;;  %v312_v32 = vsel %vm308_vm2, %v279_v1, 0.0  ;;  %vm309_vm3 = vcmp.eq.s32.totalorder %v282_v4, 2 }
  0x13   : > { %v288_v9 = vmax.f32 %v286_v5, %v287_v6  ;;  %v339_v10 = vrot.slane %v497_v8, 4  ;;  %v315_v33 = vadd.f32 %v312_v32, %v311_v31  ;;  %v313_v34 = vsel %vm309_vm3, %v280_v2, 0.0 }
  0x14   : > { %vm310_vm4 = vcmp.eq.s32.totalorder %v282_v4, 3 }
  0x15   : > { %v289_v11 = vsub.f32 %v278_v0, %v288_v9  ;;  %v290_v12 = vsub.f32 %v279_v1, %v288_v9  ;;  %v291_v13 = vsub.f32 %v280_v2, %v288_v9  ;;  %v292_v14 = vsub.f32 %v281_v3, %v288_v9 }
  0x16   : > { %v340_v15 = vadd.f32 %v497_v8, %v339_v10  ;;  %v316_v35 = vadd.f32 %v315_v33, %v313_v34  ;;  %v314_v36 = vsel %vm310_vm4, %v281_v3, 0.0 }
  0x17   : > { %v293_v16 = vmul.f32 1.442695, %v289_v11  ;;  %v295_v17 = vmul.f32 1.442695, %v290_v12  ;;  %v297_v18 = vmul.f32 1.442695, %v291_v13 }
  0x18   : > { %v299_v19 = vmul.f32 1.442695, %v292_v14  ;;  %v341_v20 = vrot.slane %v340_v15, 2  ;;  %v317_v39 = vadd.f32 %v316_v35, %v314_v36 }
  0x19   : > { %526 = vpow2.f32 %v293_v16 }
  0x1a   : > { %528 = vpow2.f32 %v295_v17  ;;  %v342_v21 = vadd.f32 %v341_v20, %v340_v15 }
  0x1b   : > { %530 = vpow2.f32 %v297_v18 }
  0x1c   : > { %532 = vpow2.f32 %v299_v19  ;;  %v343_v22 = vrot.slane %v342_v21, 1 }
  0x1e   : > { %v344_v23 = vadd.f32 %v343_v22, %v342_v21 }
  0x20   : > { %345 = vst [vmem:[%s271_s29] sm:$0x1] %v344_v23 }
  0x26   : > { %v527_v24 = vpop.eup %526 }
  0x27   : > { %v529_v25 = vpop.eup %528 }
  0x28   : > { %v531_v26 = vpop.eup %530  ;;  %v301_v27 = vadd.f32 %v529_v25, %v527_v24 }
  0x29   : > { %v533_v28 = vpop.eup %532 }
  0x2a   : > { %v302_v29 = vadd.f32 %v531_v26, %v301_v27 }
  0x2c   : > { %v303_v30 = vadd.f32 %v533_v28, %v302_v29 }
  0x2e   : > { %534 = vlog2.f32 %v303_v30 }
  0x3b   : > { %v535_v37 = vpop.eup %534 }
  0x3c   : > { %v305_v38 = vmul.f32 0.6931472, %v535_v37 }
  0x3e   : > { %v306_v40 = vadd.f32 %v305_v38, %v288_v9 }
  0x40   : > { %v318_v41 = vsub.f32 %v306_v40, %v317_v39 }
  0x42   : > { %v319_v42 = vmul.f32 %v497_v8, %v318_v41 }
  0x44   : > { %320 = vst [vmem:[%s265_s6] sm:$0xff] %v319_v42  ;;  %v331_v43 = vrot.slane %v319_v42, 4 }
  0x46   : > { %v332_v44 = vadd.f32 %v331_v43, %v319_v42 }
  0x48   : > { %v333_v45 = vrot.slane %v332_v44, 2 }
  0x4a   : > { %v334_v46 = vadd.f32 %v333_v45, %v332_v44 }
  0x4c   : > { %v335_v47 = vrot.slane %v334_v46, 1 }
  0x4e   : > { %v336_v48 = vadd.f32 %v335_v47, %v334_v46 }
  0x50   : > { %337 = vst [vmem:[%s268_s9] sm:$0x1] %v336_v48 }
  0x51 PF: > { %s15_s17 = sadd.s32 1, %s558_s17   ;;  %s643_s15 = smov %s554_s16 }
  0x52   : > { %p12_p5 = scmp.ge.s32.totalorder %s15_s17, 4   ;;  %s644_s16 = smov %s646_s18 }
  0x54   :  { %14 = sbr.rel (!%p12_p5) target bundleno = 2 (0x2), region = 93 }

</bundles_post_ra>
